<compile_context>
chip_gen: v6e
topology: v6e:2x2x1
jax: 0.10.0
libtpu: 0.0.40
codegen_flags: <defaults>
</compile_context>

<pallas_src>
import jax
import jax.numpy as jnp
from jax.experimental import pallas as pl
from jax.experimental.pallas import tpu as pltpu

INPUT_SIZE = 784
HIDDEN_SIZE = 50
N_CLASSES = 10

H_PAD = 128    # hidden 50 -> 128 (one lane-dense vreg width)
C_PAD = 128    # classes 10 -> 128 (keeps unmasked 128-lane stores)
TILE_B = 1024  # batch rows per grid step (sweet spot 512-1024; fits v5e scoped VMEM)


def mlp_kernel(x_ref, w1_ref, b1_ref, w2_ref, b2_ref, o_ref):
    # fc1: cast x to bf16 in-register (no extra HBM round trip), f32 MXU accumulation.
    x_bf16 = x_ref[...].astype(jnp.bfloat16)
    h = jnp.dot(x_bf16, w1_ref[...], preferred_element_type=jnp.float32)
    # Bias + ReLU in f32 on the VPU (padded hidden lanes stay exactly zero).
    h = jnp.maximum(h + b1_ref[...], 0.0)
    # fc2: bf16 MXU inputs, f32 accumulation; padded w2 rows are zero so padded lanes are exact.
    out = jnp.dot(h.astype(jnp.bfloat16), w2_ref[...],
                  preferred_element_type=jnp.float32)
    o_ref[...] = (out + b2_ref[...]).astype(o_ref.dtype)


def neural_net_forward(x, w1, b1, w2, b2, *, tile_b=TILE_B):
    """x: (B, 784) f32.  w1: (784, 50), b1: (50,), w2: (50, 10), b2: (10,).

    Weights are stored as (in_features, out_features), i.e. the transpose of
    PyTorch's nn.Linear weight, so y = x @ W + b.  Returns (B, 10) f32.
    """
    B = x.shape[0]
    # One full-array block for small batches; otherwise 1024-row tiles with a
    # ragged last block handled by the cdiv grid (OOB rows never mix / never returned).
    tile_b = min(tile_b, B)
    n_tiles = pl.cdiv(B, tile_b)

    # Weight prep is tiny and done once; zero padding keeps padded lanes exactly zero.
    w1_p = jnp.pad(w1, ((0, 0), (0, H_PAD - HIDDEN_SIZE))).astype(jnp.bfloat16)
    b1_p = jnp.pad(b1.reshape(1, -1), ((0, 0), (0, H_PAD - HIDDEN_SIZE))).astype(jnp.float32)
    w2_p = jnp.pad(w2, ((0, H_PAD - HIDDEN_SIZE), (0, C_PAD - N_CLASSES))).astype(jnp.bfloat16)
    b2_p = jnp.pad(b2.reshape(1, -1), ((0, 0), (0, C_PAD - N_CLASSES))).astype(jnp.float32)

    cost = pl.CostEstimate(
        flops=2 * B * INPUT_SIZE * H_PAD + 2 * B * H_PAD * C_PAD,
        transcendentals=0,
        bytes_accessed=(x.size * 4 + w1_p.size * 2 + w2_p.size * 2
                        + b1_p.size * 4 + b2_p.size * 4 + B * C_PAD * 4),
    )

    out_padded = pl.pallas_call(
        mlp_kernel,
        out_shape=jax.ShapeDtypeStruct((B, C_PAD), jnp.float32),
        grid_spec=pl.GridSpec(
            grid=(n_tiles,),
            in_specs=[
                # x tile marches with i; last dim is the full 784 (legal: equals array dim).
                pl.BlockSpec((tile_b, INPUT_SIZE), lambda i: (i, 0)),
                # weights/biases: constant block index -> stay VMEM-resident.
                pl.BlockSpec((INPUT_SIZE, H_PAD), lambda i: (0, 0)),
                pl.BlockSpec((1, H_PAD), lambda i: (0, 0)),
                pl.BlockSpec((H_PAD, C_PAD), lambda i: (0, 0)),
                pl.BlockSpec((1, C_PAD), lambda i: (0, 0)),
            ],
            out_specs=pl.BlockSpec((tile_b, C_PAD), lambda i: (i, 0)),
        ),
        compiler_params=pltpu.CompilerParams(
            dimension_semantics=("parallel",),  # shards batch tiles across TCs on v7x
        ),
        cost_estimate=cost,
    )(x, w1_p, b1_p, w2_p, b2_p)

    # Strip class padding (lane-dense 128-wide slab was written unmasked).
    return out_padded[:, :N_CLASSES]


if __name__ == "__main__":
    key = jax.random.PRNGKey(0)
    kx, k1, kb1, k2, kb2 = jax.random.split(key, 5)

    batch = 8
    x = jax.random.normal(kx, (batch, INPUT_SIZE), dtype=jnp.float32)

    # Deterministic parameter init (PyTorch-like uniform(-1/sqrt(fan_in), 1/sqrt(fan_in)))
    bound1 = 1.0 / (INPUT_SIZE ** 0.5)
    w1 = jax.random.uniform(k1, (INPUT_SIZE, HIDDEN_SIZE), jnp.float32, -bound1, bound1)
    b1 = jax.random.uniform(kb1, (HIDDEN_SIZE,), jnp.float32, -bound1, bound1)

    bound2 = 1.0 / (HIDDEN_SIZE ** 0.5)
    w2 = jax.random.uniform(k2, (HIDDEN_SIZE, N_CLASSES), jnp.float32, -bound2, bound2)
    b2 = jax.random.uniform(kb2, (N_CLASSES,), jnp.float32, -bound2, bound2)

    out = neural_net_forward(x, w1, b1, w2, b2)
    out = jax.block_until_ready(out)
    assert out.shape == (batch, N_CLASSES)

    # Reference matching the kernel's numerics (bf16 MXU inputs, f32 accumulate).
    xb = x.astype(jnp.bfloat16).astype(jnp.float32)
    w1b = w1.astype(jnp.bfloat16).astype(jnp.float32)
    w2b = w2.astype(jnp.bfloat16).astype(jnp.float32)
    h_ref = jnp.maximum(xb @ w1b + b1[None, :], 0.0)
    ref_bf16 = h_ref.astype(jnp.bfloat16).astype(jnp.float32) @ w2b + b2[None, :]
    assert jnp.allclose(out, ref_bf16, atol=1e-2, rtol=1e-2)

    # Loose check against the pure-f32 forward of the original module.
    ref_f32 = jnp.maximum(x @ w1 + b1[None, :], 0.0) @ w2 + b2[None, :]
    assert jnp.allclose(out, ref_f32, atol=5e-2, rtol=5e-2)

    print("KERNEL_OK")
</pallas_src>

<mosaic_0001>
module attributes {stable_mosaic.version = 11 : i64} {
  func.func @mlp_kernel(%arg0: i32, %arg1: memref<8x784xf32, #tpu.memory_space<vmem>>, %arg2: memref<784x128xbf16, #tpu.memory_space<vmem>>, %arg3: memref<1x128xf32, #tpu.memory_space<vmem>>, %arg4: memref<128x128xbf16, #tpu.memory_space<vmem>>, %arg5: memref<1x128xf32, #tpu.memory_space<vmem>>, %arg6: memref<8x128xf32, #tpu.memory_space<vmem>>) attributes {dimension_semantics = [#tpu.dimension_semantics<parallel>], iteration_bounds = array<i64: 1>, scalar_prefetch = 0 : i64, scratch_operands = 0 : i64, tpu.core_type = #tpu.core_type<tc>, window_params = [{transform_indices = @transform_0, window_bounds = array<i64: 8, 784>}, {pipeline_mode = #tpu.pipeline_mode<synchronous>, transform_indices = @transform_1, window_bounds = array<i64: 784, 128>}, {pipeline_mode = #tpu.pipeline_mode<synchronous>, transform_indices = @transform_2, window_bounds = array<i64: 1, 128>}, {pipeline_mode = #tpu.pipeline_mode<synchronous>, transform_indices = @transform_3, window_bounds = array<i64: 128, 128>}, {pipeline_mode = #tpu.pipeline_mode<synchronous>, transform_indices = @transform_4, window_bounds = array<i64: 1, 128>}, {transform_indices = @transform_5, window_bounds = array<i64: 8, 128>}]} {
    %c0 = arith.constant 0 : index
    %c0_0 = arith.constant 0 : index
    %0 = vector.load %arg1[%c0, %c0_0] : memref<8x784xf32, #tpu.memory_space<vmem>>, vector<8x784xf32>
    %1 = arith.truncf %0 : vector<8x784xf32> to vector<8x784xbf16>
    %c0_1 = arith.constant 0 : index
    %c0_2 = arith.constant 0 : index
    %2 = vector.load %arg2[%c0_1, %c0_2] : memref<784x128xbf16, #tpu.memory_space<vmem>>, vector<784x128xbf16>
    %cst = arith.constant dense<0.000000e+00> : vector<8x128xf32>
    %3 = tpu.matmul %1, %2, %cst {dimension_numbers = #tpu.dot_dimension_numbers<[1], [0], [0], [1], [0, 0, 1, 1], [], []>} : vector<8x784xbf16>, vector<784x128xbf16>, vector<8x128xf32> -> vector<8x128xf32>
    %c0_3 = arith.constant 0 : index
    %c0_4 = arith.constant 0 : index
    %4 = vector.load %arg3[%c0_3, %c0_4] : memref<1x128xf32, #tpu.memory_space<vmem>>, vector<1x128xf32>
    %5 = vector.broadcast %4 : vector<1x128xf32> to vector<8x128xf32>
    %6 = arith.addf %3, %5 : vector<8x128xf32>
    %cst_5 = arith.constant 0.000000e+00 : f32
    %7 = vector.broadcast %cst_5 : f32 to vector<8x128xf32>
    %8 = arith.maximumf %6, %7 : vector<8x128xf32>
    %9 = arith.truncf %8 : vector<8x128xf32> to vector<8x128xbf16>
    %c0_6 = arith.constant 0 : index
    %c0_7 = arith.constant 0 : index
    %10 = vector.load %arg4[%c0_6, %c0_7] : memref<128x128xbf16, #tpu.memory_space<vmem>>, vector<128x128xbf16>
    %cst_8 = arith.constant dense<0.000000e+00> : vector<8x128xf32>
    %11 = tpu.matmul %9, %10, %cst_8 {dimension_numbers = #tpu.dot_dimension_numbers<[1], [0], [0], [1], [0, 0, 1, 1], [], []>} : vector<8x128xbf16>, vector<128x128xbf16>, vector<8x128xf32> -> vector<8x128xf32>
    %c0_9 = arith.constant 0 : index
    %c0_10 = arith.constant 0 : index
    %12 = vector.load %arg5[%c0_9, %c0_10] : memref<1x128xf32, #tpu.memory_space<vmem>>, vector<1x128xf32>
    %13 = vector.broadcast %12 : vector<1x128xf32> to vector<8x128xf32>
    %14 = arith.addf %11, %13 : vector<8x128xf32>
    %c0_11 = arith.constant 0 : index
    %c0_12 = arith.constant 0 : index
    %15 = vector.load %arg6[%c0_11, %c0_12] : memref<8x128xf32, #tpu.memory_space<vmem>>, vector<8x128xf32>
    tpu.vector_store %arg6[%c0_11, %c0_12], %14 {strides = array<i32>} : memref<8x128xf32, #tpu.memory_space<vmem>>, vector<8x128xf32>,
    return
  }
  func.func @transform_0(%arg0: i32) -> (i32, i32) {
    %c0_i32 = arith.constant 0 : i32
    %c0_i32_0 = arith.constant 0 : i32
    return %arg0, %c0_i32 : i32, i32
  }
  func.func @transform_1(%arg0: i32) -> (i32, i32) {
    %c0_i32 = arith.constant 0 : i32
    %c0_i32_0 = arith.constant 0 : i32
    %c0_i32_1 = arith.constant 0 : i32
    return %c0_i32, %c0_i32_0 : i32, i32
  }
  func.func @transform_2(%arg0: i32) -> (i32, i32) {
    %c0_i32 = arith.constant 0 : i32
    %c0_i32_0 = arith.constant 0 : i32
    %c0_i32_1 = arith.constant 0 : i32
    return %c0_i32, %c0_i32_0 : i32, i32
  }
  func.func @transform_3(%arg0: i32) -> (i32, i32) {
    %c0_i32 = arith.constant 0 : i32
    %c0_i32_0 = arith.constant 0 : i32
    %c0_i32_1 = arith.constant 0 : i32
    return %c0_i32, %c0_i32_0 : i32, i32
  }
  func.func @transform_4(%arg0: i32) -> (i32, i32) {
    %c0_i32 = arith.constant 0 : i32
    %c0_i32_0 = arith.constant 0 : i32
    %c0_i32_1 = arith.constant 0 : i32
    return %c0_i32, %c0_i32_0 : i32, i32
  }
  func.func @transform_5(%arg0: i32) -> (i32, i32) {
    %c0_i32 = arith.constant 0 : i32
    %c0_i32_0 = arith.constant 0 : i32
    return %arg0, %c0_i32 : i32, i32
  }
}

</mosaic_0001>

<bundles_post_ra>
// kernel: tpu_custom_call.1
= control target key start
LH: loop header
LB: loop body
LE: loop exit
PB: predicated region body
PF: predicated region fallthrough
CT: control target
= control target key end

     0   :  { %10 = vsyncpa [#allocation3], 0  ;;  %s1151_s0 = inlined_call_operand.hbm [shape: f32[8,784], index: 0, kind: input, shape index: {}]   ;;  %s1152_s1 = inlined_call_operand.hbm [shape: bf16[784,128], index: 1, kind: input, shape index: {}]   ;;  %s1153_s2 = inlined_call_operand.vmem [shape: f32[1,128], index: 2, kind: input, shape index: {}]   ;;  %s1154_s3 = inlined_call_operand.hbm [shape: bf16[128,128], index: 3, kind: input, shape index: {}]   ;;  %s1155_s4 = inlined_call_operand.vmem [shape: f32[1,128], index: 4, kind: input, shape index: {}]   ;;  %s1156_s5 = inlined_call_operand.hbm [shape: f32[8,128], index: 5, kind: output, shape index: {}]  }
   0x1   :  { %11 = vsyncpa [#allocation6], 0 }
   0x2   :  { %12 = vsyncpa [#allocation4], 0  ;;  %s1082_s18 = smov [#allocation5]  }
   0x3   :  { %s28_s19 = sshll.u32 %s1082_s18, 4  ;;  %s29_s19 = int_to_ptr.vmem [resolvable:$true] %s28_s19 }
   0x4   :  { %s1004_s20 = scalar_lea.vmem %s29_s19, 6272  ;;  %p1009_p1 = scmp.lt.s32.totalorder %s29_s19, %s29_s19 }
   0x5   :  { %p1005_p0 = scmp.ne.s32.totalorder %s29_s19, %s1004_s20  ;;  %p1010_p2 = scmp.lt.s32.totalorder %s1004_s20, %s1004_s20 }
   0x7   :  { %p1011_p3 = por %p1010_p2, %p1009_p1 }
   0x9   :  { %p1012_p4 = pnand %p1011_p3, %p1005_p0 }
   0xb   :  { %1015 = shalt.err (!%p1012_p4)
}
   0xc   :  { %s1083_s21 = smov 64   ;;  %s1084_s22 = smov 4  }
   0xd   :  { %34 = dma.hbm_to_vmem [thread:$0]  %s1152_s1, 6272, %s29_s19, [#allocation6], %s1083_s21, %s1083_s21, %s1084_s22  }
   0xe   :  { %s1085_s25 = smov [#allocation2]   ;;  %s1086_s27 = smov [#allocation7]  }
   0xf   :  { %s19_s26 = sshll.u32 %s1085_s25, 4  ;;  %s42_s28 = sshll.u32 %s1086_s27, 4  ;;  %s20_s26 = int_to_ptr.vmem [resolvable:$true] %s19_s26  ;;  %s43_s28 = int_to_ptr.vmem [resolvable:$true] %s42_s28 }
  0x10   :  { %s1024_s29 = scalar_lea.vmem %s20_s26, 896  ;;  %p1029_p6 = scmp.lt.s32.totalorder %s20_s26, %s20_s26 }
  0x11   :  { %p1025_p5 = scmp.ne.s32.totalorder %s20_s26, %s1024_s29  ;;  %p1030_p7 = scmp.lt.s32.totalorder %s1024_s29, %s1024_s29 }
  0x13   :  { %p1031_p8 = por %p1030_p7, %p1029_p6 }
  0x15   :  { %p1032_p9 = pnand %p1031_p8, %p1025_p5 }
  0x17   :  { %1035 = shalt.err (!%p1032_p9)
}
  0x18   :  { %22 = dma.hbm_to_vmem [thread:$0]  %s1151_s0, 896, %s20_s26, [#allocation3]  }
  0x19   :  { %s1044_s7 = scalar_lea.vmem %s43_s28, 1024  ;;  %p1049_p11 = scmp.lt.s32.totalorder %s43_s28, %s43_s28 }
  0x1a   :  { %p1045_p10 = scmp.ne.s32.totalorder %s43_s28, %s1044_s7  ;;  %p1050_p12 = scmp.lt.s32.totalorder %s1044_s7, %s1044_s7 }
  0x1c   :  { %p1051_p13 = por %p1050_p12, %p1049_p11 }
  0x1e   :  { %p1052_p0 = pnand %p1051_p13, %p1045_p10 }
  0x20   :  { %1055 = shalt.err (!%p1052_p0)
}
  0x21   :  { %48 = dma.hbm_to_vmem [thread:$0]  %s1154_s3, 1024, %s43_s28, [#allocation6], %s1083_s21, %s1083_s21, %s1084_s22  }
  0x22   :  { %1076 = dma.done.wait [#allocation3], 896  }
  0x23   :  { %1077 = vsyncadd [#allocation3], 4294966400 }
  0x24   :  { %1078 = dma.done.wait [#allocation6], 7296  }
  0x25   :  { %1079 = vsyncadd [#allocation6], 4294960000  ;;  %v939_v0 = vld [vmem:[#allocation5 + $0x78] sm:$0xff]   ;;  %v943_v4 = vld [vmem:[#allocation5 + $0x70] sm:$0xff]   ;;  %v1087_v44 = vmov 0.0   ;;  %vm1088_vm0 = vmmov 0  }
  0x26   :  { %v940_v1 = vld [vmem:[#allocation5 + $0x38] sm:$0xff]   ;;  %828 = vmatprep.subr.bf16.mxu0 %v939_v0  ;;  %v944_v5 = vld [vmem:[#allocation5 + $0x30] sm:$0xff]   ;;  %v947_v8 = vld [vmem:[#allocation5 + $0x68] sm:$0xff]   ;;  %vm474_vm1 = vcmask 130048   ;;  %s1089_s11 = smov [#allocation8]  }
  0x27   :  { %v941_v2 = vld [vmem:[#allocation5 + $0xf8] sm:$0xff]   ;;  %829 = vmatpush3.bf16.msra.mxu0 %v940_v1  ;;  %v945_v6 = vld [vmem:[#allocation5 + $0xf0] sm:$0xff]   ;;  %v948_v9 = vld [vmem:[#allocation5 + $0x28] sm:$0xff]   ;;  %s758_s12 = sshll.u32 %s1089_s11, 4  ;;  %s759_s12 = int_to_ptr.vmem [resolvable:$true] %s758_s12 }
  0x28   :  { %v942_v3 = vld [vmem:[#allocation5 + $0xb8] sm:$0xff]   ;;  %850 = vmatprep.subr.bf16.mxu1 %v941_v2  ;;  %830 = vmatprep.subr.bf16.mxu0 %v943_v4  ;;  %v946_v7 = vld [vmem:[#allocation5 + $0xb0] sm:$0xff]   ;;  %v949_v10 = vld [vmem:[#allocation5 + $0xe8] sm:$0xff]   ;;  %p1061_p2 = scmp.lt.s32.totalorder %s759_s12, %s759_s12 }
  0x29   :  { %851 = vmatpush3.bf16.msra.mxu1 %v942_v3  ;;  %v950_v11 = vld [vmem:[#allocation5 + $0xa8] sm:$0xff]   ;;  %v951_v12 = vld [vmem:[#allocation5 + $0x60] sm:$0xff]   ;;  %v955_v16 = vld [vmem:[#allocation5 + $0x58] sm:$0xff]  }
  0x2a   :  { %852 = vmatprep.subr.bf16.mxu1 %v945_v6  ;;  %v952_v13 = vld [vmem:[#allocation5 + $0x20] sm:$0xff]   ;;  %v956_v17 = vld [vmem:[#allocation5 + $0x18] sm:$0xff]   ;;  %v959_v20 = vld [vmem:[#allocation5 + $0x50] sm:$0xff]  }
  0x2b   :  { %831 = vmatpush3.bf16.msra.mxu0 %v944_v5  ;;  %v953_v14 = vld [vmem:[#allocation5 + $0xe0] sm:$0xff]   ;;  %v957_v18 = vld [vmem:[#allocation5 + $0xd8] sm:$0xff]   ;;  %v960_v21 = vld [vmem:[#allocation5 + $0x10] sm:$0xff]  }
  0x2c   :  { %832 = vmatprep.subr.bf16.mxu0 %v947_v8  ;;  %v954_v15 = vld [vmem:[#allocation5 + $0xa0] sm:$0xff]   ;;  %v958_v19 = vld [vmem:[#allocation5 + $0x98] sm:$0xff]   ;;  %v961_v22 = vld [vmem:[#allocation5 + $0xd0] sm:$0xff]  }
  0x2d   :  { %853 = vmatpush3.bf16.msra.mxu1 %v946_v7  ;;  %v962_v23 = vld [vmem:[#allocation5 + $0x90] sm:$0xff]   ;;  %v963_v24 = vld [vmem:[#allocation5 + $0x48] sm:$0xff]   ;;  %v967_v28 = vld [vmem:[#allocation5 + $0x40] sm:$0xff]  }
  0x2e   :  { %854 = vmatprep.subr.bf16.mxu1 %v949_v10  ;;  %v964_v25 = vld [vmem:[#allocation5 + $0x8] sm:$0xff]   ;;  %v968_v29 = vld [vmem:[#allocation5] sm:$0xff]   ;;  %v62_v31 = vld [vmem:[#allocation2 + $0x8] sm:$0xff] }
  0x2f   :  { %833 = vmatpush3.bf16.msra.mxu0 %v948_v9  ;;  %v965_v26 = vld [vmem:[#allocation5 + $0xc8] sm:$0xff]   ;;  %v969_v30 = vld [vmem:[#allocation5 + $0xc0] sm:$0xff]   ;;  %v69_v32 = vpack.c.bf16 %v62_v31, %v62_v31  ;;  %v971_v36 = vld [vmem:[#allocation5 + $0x178] sm:$0xff]  }
  0x30   :  { %834 = vmatprep.subr.bf16.mxu0 %v951_v12  ;;  %v966_v27 = vld [vmem:[#allocation5 + $0x88] sm:$0xff]   ;;  %v970_v33 = vld [vmem:[#allocation5 + $0x80] sm:$0xff]   ;;  %v972_v39 = vld [vmem:[#allocation5 + $0x138] sm:$0xff]  }
  0x31   :  { %855 = vmatpush3.bf16.msra.mxu1 %v950_v11  ;;  %v61_v34 = vld [vmem:[#allocation2] sm:$0xff]  ;;  %v64_v37 = vld [vmem:[#allocation2 + $0x18] sm:$0xff]  ;;  %510 = vmatprep.mubr.bf16.mxu0 %v69_v32  ;;  %v63_v40 = vld [vmem:[#allocation2 + $0x10] sm:$0xff] }
  0x32   :  { %856 = vmatprep.subr.bf16.mxu1 %v953_v14  ;;  %v68_v35 = vpack.c.bf16 %v61_v34, %v61_v34  ;;  %v71_v38 = vpack.c.bf16 %v64_v37, %v64_v37  ;;  %v70_v41 = vpack.c.bf16 %v63_v40, %v63_v40  ;;  %v973_v42 = vld [vmem:[#allocation5 + $0x170] sm:$0xff]   ;;  %v975_v45 = vld [vmem:[#allocation5 + $0x168] sm:$0xff]   ;;  %v977_v47 = vld [vmem:[#allocation5 + $0x160] sm:$0xff]  }
  0x33   :  { %835 = vmatpush3.bf16.msra.mxu0 %v952_v13  ;;  %v974_v43 = vld [vmem:[#allocation5 + $0x130] sm:$0xff]   ;;  %v976_v46 = vld [vmem:[#allocation5 + $0x128] sm:$0xff]   ;;  %v978_v48 = vld [vmem:[#allocation5 + $0x120] sm:$0xff]  }
  0x34   :  { %836 = vmatprep.subr.bf16.mxu0 %v955_v16  ;;  %550 = vmatprep.mubr.bf16.mxu1 %v71_v38  ;;  %v979_v49 = vld [vmem:[#allocation5 + $0x158] sm:$0xff]   ;;  %v981_v51 = vld [vmem:[#allocation5 + $0x150] sm:$0xff]   ;;  %v987_v53 = vld [vmem:[#allocation5 + $0x180] sm:$0xff]  }
  0x35   :  { %857 = vmatpush3.bf16.msra.mxu1 %v954_v15  ;;  %v980_v50 = vld [vmem:[#allocation5 + $0x118] sm:$0xff]   ;;  %v982_v52 = vld [vmem:[#allocation5 + $0x110] sm:$0xff]   ;;  %v983_v55 = vld [vmem:[#allocation5 + $0x148] sm:$0xff]  }
  0x36   :  { %858 = vmatprep.subr.bf16.mxu1 %v957_v18  ;;  %v66_v54 = vld [vmem:[#allocation2 + $0x28] sm:$0xff]  ;;  %v67_v57 = vld [vmem:[#allocation2 + $0x30] sm:$0xff]  ;;  %v984_v59 = vld [vmem:[#allocation5 + $0x108] sm:$0xff]  }
  0x37   :  { %837 = vmatpush3.bf16.msra.mxu0 %v956_v17  ;;  %v73_v56 = vpack.c.bf16 %v66_v54, %v66_v54  ;;  %v74_v58 = vpack.c.bf16 %v67_v57, %v67_v57  ;;  %v985_v60 = vld [vmem:[#allocation5 + $0x140] sm:$0xff]   ;;  %v65_v62 = vld [vmem:[#allocation2 + $0x20] sm:$0xff]  ;;  %v989_v1 = vld [vmem:[#allocation7 + $0x30] sm:$0xff]  }
  0x38   :  { %838 = vmatprep.subr.bf16.mxu0 %v959_v20  ;;  %v986_v61 = vld [vmem:[#allocation5 + $0x100] sm:$0xff]   ;;  %v72_v63 = vpack.c.bf16 %v65_v62, %v65_v62  ;;  %v990_v2 = vld [vmem:[#allocation7 + $0x28] sm:$0xff]   ;;  %v991_v3 = vld [vmem:[#allocation7 + $0x20] sm:$0xff]  }
  0x39   :  { %859 = vmatpush3.bf16.msra.mxu1 %v958_v19  ;;  %v988_v0 = vld [vmem:[#allocation7 + $0x38] sm:$0xff]   ;;  %v993_v5 = vld [vmem:[#allocation7 + $0x10] sm:$0xff]   ;;  %v994_v6 = vld [vmem:[#allocation7 + $0x8] sm:$0xff]  }
  0x3a   :  { %860 = vmatprep.subr.bf16.mxu1 %v961_v22  ;;  %v992_v4 = vld [vmem:[#allocation7 + $0x18] sm:$0xff]   ;;  %v995_v7 = vld [vmem:[#allocation7] sm:$0xff]  }
  0x3b   :  { %839 = vmatpush3.bf16.msra.mxu0 %v960_v21  ;;  %v768_v21 = vld [vmem:[%s1153_s2] ss:$0 sm:$0xff]  ;;  %s1056_s2 = scalar_lea.vmem %s759_s12, 128 }
  0x3c   :  { %840 = vmatprep.subr.bf16.mxu0 %v963_v24  ;;  %v819_v34 = vld [vmem:[%s1155_s4] ss:$0 sm:$0xff]  ;;  %p1057_p1 = scmp.ne.s32.totalorder %s759_s12, %s1056_s2  ;;  %p1062_p3 = scmp.lt.s32.totalorder %s1056_s2, %s1056_s2 }
  0x3d   :  { %861 = vmatpush3.bf16.msra.mxu1 %v962_v23 }
  0x3e   :  { %862 = vmatprep.subr.bf16.mxu1 %v965_v26  ;;  %p1063_p4 = por %p1062_p3, %p1061_p2 }
  0x3f   :  { %841 = vmatpush3.bf16.msra.mxu0 %v964_v25 }
  0x40   :  { %842 = vmatprep.subr.bf16.mxu0 %v967_v28  ;;  %p1064_p5 = pnand %p1063_p4, %p1057_p1 }
  0x41   :  { %863 = vmatpush3.bf16.msra.mxu1 %v966_v27 }
  0x42   :  { %864 = vmatprep.subr.bf16.mxu1 %v969_v30 }
  0x43   :  { %843 = vmatpush3.bf16.msra.mxu0 %v968_v29 }
  0x44   :  { %872 = vmatprep.subr.bf16.mxu0 %v971_v36 }
  0x45   :  { %865 = vmatpush3.bf16.msra.mxu1 %v970_v33 }
  0x46   :  { %511 = vmatmul.mubr.bf16.vlgmr.msra.gmra.mxu0 %v68_v35  ;;  %905 = vmatprep.subr.bf16.mxu1 %v1087_v44 }
  0x47   :  { %873 = vmatpush3.bf16.msra.mxu0 %v972_v39  ;;  %590 = vmatprep.mubr.bf16.mxu0 %v73_v56 }
  0x48   :  { %551 = vmatmul.mubr.bf16.vlgmr.msra.gmra.mxu1 %v70_v41  ;;  %874 = vmatprep.subr.bf16.mxu0 %v973_v42 }
  0x49   :  { %907 = vmatprep.mubr.msk.bf16.mxu1 %vm1088_vm0, %v1087_v44  ;;  %906 = vmatpush3.bf16.msra.mxu1 %v987_v53 }
  0x4a   :  { %911 = vmatprep.subr.bf16.mxu1 %v1087_v44 }
  0x4b   :  { %875 = vmatpush3.bf16.msra.mxu0 %v974_v43 }
  0x4c   :  { %876 = vmatprep.subr.bf16.mxu0 %v975_v45 }
  0x4f   :  { %877 = vmatpush3.bf16.msra.mxu0 %v976_v46 }
  0x50   :  { %878 = vmatprep.subr.bf16.mxu0 %v977_v47  ;;  %908 = vmatmul.mubr.msk.bf16.vlgmr.msra.gmra.mxu1 %vm474_vm1, %v74_v58 }
  0x51   :  { %927 = vmatprep.mubr.msk.bf16.mxu1 %vm1088_vm0, %v1087_v44  ;;  %912 = vmatpush3.bf16.msra.mxu1 %v988_v0 }
  0x52   :  { %913 = vmatprep.subr.bf16.mxu1 %v1087_v44 }
  0x53   :  { %879 = vmatpush3.bf16.msra.mxu0 %v978_v48 }
  0x54   :  { %880 = vmatprep.subr.bf16.mxu0 %v979_v49 }
  0x55   :  { %914 = vmatpush3.bf16.msra.mxu1 %v989_v1 }
  0x56   :  { %915 = vmatprep.subr.bf16.mxu1 %v1087_v44 }
  0x57   :  { %881 = vmatpush3.bf16.msra.mxu0 %v980_v50 }
  0x58   :  { %882 = vmatprep.subr.bf16.mxu0 %v981_v51 }
  0x59   :  { %916 = vmatpush3.bf16.msra.mxu1 %v990_v2 }
  0x5a   :  { %917 = vmatprep.subr.bf16.mxu1 %v1087_v44 }
  0x5b   :  { %883 = vmatpush3.bf16.msra.mxu0 %v982_v52 }
  0x5c   :  { %884 = vmatprep.subr.bf16.mxu0 %v983_v55 }
  0x5d   :  { %918 = vmatpush3.bf16.msra.mxu1 %v991_v3 }
  0x5e   :  { %919 = vmatprep.subr.bf16.mxu1 %v1087_v44 }
  0x5f   :  { %885 = vmatpush3.bf16.msra.mxu0 %v984_v59 }
  0x60   :  { %886 = vmatprep.subr.bf16.mxu0 %v985_v60 }
  0x61   :  { %920 = vmatpush3.bf16.msra.mxu1 %v992_v4 }
  0x62   :  { %921 = vmatprep.subr.bf16.mxu1 %v1087_v44 }
  0x63   :  { %887 = vmatpush3.bf16.msra.mxu0 %v986_v61 }
  0x65   :  { %922 = vmatpush3.bf16.msra.mxu1 %v993_v5 }
  0x66   :  { %591 = vmatmul.mubr.bf16.vlgmr.msra.gmra.mxu0 %v72_v63  ;;  %923 = vmatprep.subr.bf16.mxu1 %v1087_v44 }
  0x69   :  { %924 = vmatpush3.bf16.msra.mxu1 %v994_v6 }
  0x6a   :  { %925 = vmatprep.subr.bf16.mxu1 %v1087_v44 }
  0x6d   :  { %926 = vmatpush3.bf16.msra.mxu1 %v995_v7 }
 0x106   :  { %v844_v8 = vpop.f32.mrf.mxu0 }
 0x108   :  { %v845_v9 = vpop.f32.mrf.mxu0  ;;  %v866_v10 = vpop.f32.mrf.mxu1 }
 0x109   :  { %v846_v20 = vadd.f32 %v845_v9, %v844_v8 }
 0x10a   :  { %v847_v11 = vpop.f32.mrf.mxu0  ;;  %v867_v12 = vpop.f32.mrf.mxu1 }
 0x10b   :  { %v513_v22 = vadd.f32 %v846_v20, %v768_v21  ;;  %v868_v23 = vadd.f32 %v867_v12, %v866_v10 }
 0x10c   :  { %v848_v13 = vpop.f32.mrf.mxu0  ;;  %v869_v14 = vpop.f32.mrf.mxu1 }
 0x10d   :  { %v553_v26 = vadd.f32 %v868_v23, %v513_v22 }
 0x10e   :  { %v870_v15 = vpop.f32.mrf.mxu1 }
 0x110   :  { %v632_v16 = vpop.f32.mrf.mxu1 }
 0x112   :  { %v909_v17 = vpop.f32.mrf.mxu1 }
 0x114   :  { %v635_v18 = vpop.f32.mrf.mxu1 }
 0x116   :  { %v910_v19 = vpop.f32.mrf.mxu1 }
 0x126   :  { %v888_v24 = vpop.f32.mrf.mxu0 }
 0x128   :  { %v889_v25 = vpop.f32.mrf.mxu0 }
 0x129   :  { %v890_v27 = vadd.f32 %v889_v25, %v888_v24 }
 0x12a   :  { %v891_v28 = vpop.f32.mrf.mxu0 }
 0x12b   :  { %v593_v29 = vadd.f32 %v890_v27, %v553_v26 }
 0x12c   :  { %v892_v30 = vpop.f32.mrf.mxu0 }
 0x12d   :  { %v633_v31 = vadd.f32 %v632_v16, %v593_v29 }
 0x12f   :  { %v638_v32 = vmax.f32 %v633_v31, 0.0 }
 0x131   :  { %v639_v33 = vpack.c.bf16 %v638_v32, %v638_v32 }
 0x133   :  { %928 = vmatmul.mubr.bf16.vlgmr.msra.gmra.mxu1 %v639_v33 }
 0x1f3   :  { %v745_v35 = vpop.f32.mrf.mxu1 }
 0x1f4   :  { %v746_v36 = vadd.f32 %v819_v34, %v745_v35 }
 0x1f5   :  { %v929_v37 = vpop.f32.mrf.mxu1 }
 0x1f6   :  { %751 = vst [vmem:[#allocation8] sm:$0xff] %v746_v36 }
 0x1f7   :  { %v748_v38 = vpop.f32.mrf.mxu1 }
 0x1f8   :  { %1067 = shalt.err (!%p1064_p5)
}
 0x1f9   :  { %761 = dma.vmem_to_hbm [thread:$0]  %s759_s12, 128, %s1156_s5, [#allocation4]   ;;  %v930_v39 = vpop.f32.mrf.mxu1 }
 0x1fa   :  { %1080 = dma.done.wait [#allocation4], 128  }
 0x1fb   :  { %1081 = vsyncadd [#allocation4], 4294967168 }
 0x1fc   :  { %765 = vsyncpa [#allocation3], 1 }
 0x1fd   :  { %766 = vsyncpa [#allocation6], 1 }
 0x1fe   :  { %767 = vsyncpa [#allocation4], 1 }

</bundles_post_ra>
